<compile_context>
chip_gen: v7x
topology: tpu7x:2x2x1
jax: 0.10.0
libtpu: 0.0.40
codegen_flags: <defaults>
</compile_context>

<pallas_src>
import functools

import jax
import jax.numpy as jnp
from jax.experimental import pallas as pl
from jax.experimental.pallas import tpu as pltpu

BN_EPS = 1e-5
SIGMA_EPS = 1e-6
LANE = 128  # all hidden/head feature dims padded to one full vreg lane width


def _round_up(n, m):
    return ((n + m - 1) // m) * m


# ---------------------------------------------------------------------------
# Kernel: three matmuls (bf16 in, f32 acc), bias rows pulled from the weight slab,
# ReLU epilogues, sigma ReLU+eps on lanes >= act_dim (padding lanes are sliced off).
# ---------------------------------------------------------------------------
def actor_kernel(x_ref, w_ref, out_ref, *, obs_k: int, act_dim: int):
    x = x_ref[...]  # [B, obs_k] bf16

    # encoder layer 1: (Linear ∘ BN-eval) folded -> ReLU   (Dropout = identity in eval)
    h = jnp.dot(x, w_ref[0, :obs_k, :], preferred_element_type=jnp.float32)
    h += w_ref[0, LANE:LANE + 1, :].astype(jnp.float32)
    h = jnp.maximum(h, 0.0)

    # encoder layer 2: (Linear ∘ BN-eval) folded -> ReLU
    h = jnp.dot(h.astype(jnp.bfloat16), w_ref[1, :LANE, :],
                preferred_element_type=jnp.float32)
    h += w_ref[1, LANE:LANE + 1, :].astype(jnp.float32)
    h = jnp.maximum(h, 0.0)

    # fused heads: lanes [0, act_dim) = mu (identity), [act_dim, 2*act_dim) = sigma pre-act
    head = jnp.dot(h.astype(jnp.bfloat16), w_ref[2, :LANE, :],
                   preferred_element_type=jnp.float32)
    head += w_ref[2, LANE:LANE + 1, :].astype(jnp.float32)

    # sigma epilogue: lanes >= act_dim get ReLU + eps.  Lanes >= 2*act_dim are never
    # read by the wrapper, so a single comparison suffices (iota is native; a baked
    # dense constant mask buys nothing on this non-critical, slack-filled path).
    col = jax.lax.broadcasted_iota(jnp.int32, head.shape, 1)
    out_ref[...] = jnp.where(col >= act_dim, jnp.maximum(head, 0.0) + SIGMA_EPS, head)


# ---------------------------------------------------------------------------
# Wrapper: jitted, no obs padding (unless obs_dim is not 8-aligned), single
# gridless pallas_call with everything resident in VMEM, one output slice.
# ---------------------------------------------------------------------------
@functools.partial(jax.jit, static_argnames=("layer_sizes",))
def stochastic_actor_forward(obs, w_slab, *, layer_sizes):
    """obs: f32[B, obs_dim]; returns (mu f32[B, act_dim], sigma f32[B, act_dim])."""
    obs_dim, _, _, act_dim = layer_sizes
    B = obs.shape[0]
    obs_k = _round_up(obs_dim, 8)

    x = obs.astype(jnp.bfloat16)
    if obs_k != obs_dim:  # only if obs_dim is not sublane-aligned (not the case here)
        x = jnp.pad(x, ((0, 0), (0, obs_k - obs_dim)))

    flops = 2 * B * (obs_k + 2 * LANE) * LANE
    bytes_accessed = w_slab.size * 2 + B * obs_k * 2 + B * LANE * 4

    out = pl.pallas_call(
        functools.partial(actor_kernel, obs_k=obs_k, act_dim=act_dim),
        out_shape=jax.ShapeDtypeStruct((B, LANE), jnp.float32),
        in_specs=[
            pl.BlockSpec(memory_space=pltpu.MemorySpace.VMEM),  # x      [B, obs_k] bf16
            pl.BlockSpec(memory_space=pltpu.MemorySpace.VMEM),  # w slab [3, 136, 128] bf16
        ],
        out_specs=pl.BlockSpec(memory_space=pltpu.MemorySpace.VMEM),
        cost_estimate=pl.CostEstimate(
            flops=flops, transcendentals=0, bytes_accessed=bytes_accessed),
    )(x, w_slab)

    head = out[:, :2 * act_dim]          # single slice of the lane-dense output
    return head[:, :act_dim], head[:, act_dim:]


# ---------------------------------------------------------------------------
# Param prep: fold BN(eval) into Linears, fuse heads, pack weights + biases into
# ONE bf16 slab [3, 128+8, 128]; bias of layer i lives in row 128 of tile i.
# ---------------------------------------------------------------------------
def fold_and_pack(p, layer_sizes, lane=LANE):
    obs_dim, h1, h2, act_dim = layer_sizes
    assert max(obs_dim, h1, h2, 2 * act_dim) <= lane, "dims must fit in one 128-lane tile"

    s1 = p["g1"] * jax.lax.rsqrt(p["v1"] + BN_EPS)              # [1, h1]
    w1 = p["w1"] * s1                                            # [obs_dim, h1]
    b1 = (p["b1"] - p["m1"]) * s1 + p["be1"]                     # [1, h1]

    s2 = p["g2"] * jax.lax.rsqrt(p["v2"] + BN_EPS)
    w2 = p["w2"] * s2                                            # [h1, h2]
    b2 = (p["b2"] - p["m2"]) * s2 + p["be2"]                     # [1, h2]

    wh = jnp.concatenate([p["wmu"], p["wsg"]], axis=1)           # [h2, 2*act_dim]
    bh = jnp.concatenate([p["bmu"], p["bsg"]], axis=1)           # [1, 2*act_dim]

    def pack(w, b):
        tile = jnp.zeros((lane + 8, lane), jnp.float32)
        tile = tile.at[:w.shape[0], :w.shape[1]].set(w.astype(jnp.float32))
        tile = tile.at[lane, :b.shape[1]].set(b[0].astype(jnp.float32))
        return tile

    w_slab = jnp.stack([pack(w1, b1), pack(w2, b2), pack(wh, bh)], axis=0)
    return w_slab.astype(jnp.bfloat16)                           # [3, 136, 128] bf16


def make_params(key, layer_sizes, exploration_noise=1.0):
    """Synthetic parameters matching the module's __init__ shapes.

    layer_sizes = [obs_dim, h1, h2, act_dim]
    encoder: Linear(obs_dim,h1)+BN(h1), Linear(h1,h2)+BN(h2)
    mu:      Linear(h2, act_dim)
    sigma:   Linear(h2, act_dim) with bias initialized to explorationNoise
    """
    obs_dim, h1, h2, act_dim = layer_sizes
    keys = jax.random.split(key, 16)
    k = iter(keys)

    def lin(kw, fan_in, fan_out):
        scale = 1.0 / jnp.sqrt(jnp.float32(fan_in))
        return jax.random.normal(kw, (fan_in, fan_out), jnp.float32) * scale

    params = {
        # encoder layer 1
        "w1": lin(next(k), obs_dim, h1),
        "b1": jax.random.normal(next(k), (1, h1), jnp.float32) * 0.01,
        "g1": 1.0 + 0.1 * jax.random.normal(next(k), (1, h1), jnp.float32),
        "be1": 0.05 * jax.random.normal(next(k), (1, h1), jnp.float32),
        "m1": 0.1 * jax.random.normal(next(k), (1, h1), jnp.float32),
        "v1": jnp.abs(jax.random.normal(next(k), (1, h1), jnp.float32)) + 0.5,
        # encoder layer 2
        "w2": lin(next(k), h1, h2),
        "b2": jax.random.normal(next(k), (1, h2), jnp.float32) * 0.01,
        "g2": 1.0 + 0.1 * jax.random.normal(next(k), (1, h2), jnp.float32),
        "be2": 0.05 * jax.random.normal(next(k), (1, h2), jnp.float32),
        "m2": 0.1 * jax.random.normal(next(k), (1, h2), jnp.float32),
        "v2": jnp.abs(jax.random.normal(next(k), (1, h2), jnp.float32)) + 0.5,
        # mu head
        "wmu": lin(next(k), h2, act_dim),
        "bmu": jax.random.normal(next(k), (1, act_dim), jnp.float32) * 0.01,
        # sigma head (bias initialized to explorationNoise, per {'bias': explorationNoise})
        "wsg": lin(next(k), h2, act_dim),
        "bsg": jnp.full((1, act_dim), exploration_noise, jnp.float32),
    }
    return params


# ---------------------------------------------------------------------------
# Pure-JAX reference (un-folded, un-fused, all f32) for correctness checking.
# ---------------------------------------------------------------------------
def _bn_eval(x, gamma, beta, mean, var):
    return gamma * (x - mean) * jax.lax.rsqrt(var + BN_EPS) + beta


def reference_forward(obs, p):
    h = obs @ p["w1"] + p["b1"]
    h = _bn_eval(h, p["g1"], p["be1"], p["m1"], p["v1"])
    h = jnp.maximum(h, 0.0)
    h = h @ p["w2"] + p["b2"]
    h = _bn_eval(h, p["g2"], p["be2"], p["m2"], p["v2"])
    h = jnp.maximum(h, 0.0)
    mu = h @ p["wmu"] + p["bmu"]
    sg = jnp.maximum(h @ p["wsg"] + p["bsg"], 0.0) + SIGMA_EPS
    return mu, sg


if __name__ == "__main__":
    # layerSizes = [obs_dim, hidden1, hidden2, act_dim]
    layer_sizes = (16, 32, 32, 4)
    B = 8

    key = jax.random.PRNGKey(0)
    k_obs, k_par = jax.random.split(key)
    obs = jax.random.normal(k_obs, (B, layer_sizes[0]), jnp.float32)
    params = make_params(k_par, list(layer_sizes), exploration_noise=1.0)
    w_slab = fold_and_pack(params, layer_sizes)

    mu, sigma = stochastic_actor_forward(obs, w_slab, layer_sizes=layer_sizes)
    mu, sigma = jax.block_until_ready(mu), jax.block_until_ready(sigma)

    mu_ref, sigma_ref = reference_forward(obs, params)
    assert mu.shape == mu_ref.shape and sigma.shape == sigma_ref.shape
    # bf16 weights/activations (f32 accumulation): loosened tolerance vs f32 reference.
    assert jnp.allclose(mu, mu_ref, atol=3e-2, rtol=3e-2)
    assert jnp.allclose(sigma, sigma_ref, atol=3e-2, rtol=3e-2)
    assert bool(jnp.all(sigma > 0.0))

    print("KERNEL_OK")
</pallas_src>

<mosaic_0001>
module attributes {stable_mosaic.version = 11 : i64} {
  func.func @actor_kernel(%arg0: memref<8x16xbf16, #tpu.memory_space<vmem>>, %arg1: memref<3x136x128xbf16, #tpu.memory_space<vmem>>, %arg2: memref<8x128xf32, #tpu.memory_space<vmem>>) attributes {dimension_semantics = [], scalar_prefetch = 0 : i64, scratch_operands = 0 : i64, tpu.core_type = #tpu.core_type<tc>} {
    %c0 = arith.constant 0 : index
    %c0_0 = arith.constant 0 : index
    %0 = vector.load %arg0[%c0, %c0_0] : memref<8x16xbf16, #tpu.memory_space<vmem>>, vector<8x16xbf16>
    %c0_1 = arith.constant 0 : index
    %c0_2 = arith.constant 0 : index
    %c0_3 = arith.constant 0 : index
    %1 = vector.load %arg1[%c0_1, %c0_2, %c0_3] : memref<3x136x128xbf16, #tpu.memory_space<vmem>>, vector<1x16x128xbf16>
    %2 = vector.shape_cast %1 : vector<1x16x128xbf16> to vector<16x128xbf16>
    %cst = arith.constant dense<0.000000e+00> : vector<8x128xf32>
    %3 = tpu.matmul %0, %2, %cst {dimension_numbers = #tpu.dot_dimension_numbers<[1], [0], [0], [1], [0, 0, 1, 1], [], []>} : vector<8x16xbf16>, vector<16x128xbf16>, vector<8x128xf32> -> vector<8x128xf32>
    %c0_4 = arith.constant 0 : index
    %c128 = arith.constant 128 : index
    %c0_5 = arith.constant 0 : index
    %4 = vector.load %arg1[%c0_4, %c128, %c0_5] : memref<3x136x128xbf16, #tpu.memory_space<vmem>>, vector<1x1x128xbf16>
    %5 = vector.shape_cast %4 : vector<1x1x128xbf16> to vector<1x128xbf16>
    %6 = arith.extf %5 : vector<1x128xbf16> to vector<1x128xf32>
    %7 = vector.broadcast %6 : vector<1x128xf32> to vector<8x128xf32>
    %8 = arith.addf %3, %7 : vector<8x128xf32>
    %cst_6 = arith.constant 0.000000e+00 : f32
    %9 = vector.broadcast %cst_6 : f32 to vector<8x128xf32>
    %10 = arith.maximumf %8, %9 : vector<8x128xf32>
    %11 = arith.truncf %10 : vector<8x128xf32> to vector<8x128xbf16>
    %c1 = arith.constant 1 : index
    %c0_7 = arith.constant 0 : index
    %c0_8 = arith.constant 0 : index
    %12 = vector.load %arg1[%c1, %c0_7, %c0_8] : memref<3x136x128xbf16, #tpu.memory_space<vmem>>, vector<1x128x128xbf16>
    %13 = vector.shape_cast %12 : vector<1x128x128xbf16> to vector<128x128xbf16>
    %cst_9 = arith.constant dense<0.000000e+00> : vector<8x128xf32>
    %14 = tpu.matmul %11, %13, %cst_9 {dimension_numbers = #tpu.dot_dimension_numbers<[1], [0], [0], [1], [0, 0, 1, 1], [], []>} : vector<8x128xbf16>, vector<128x128xbf16>, vector<8x128xf32> -> vector<8x128xf32>
    %c1_10 = arith.constant 1 : index
    %c128_11 = arith.constant 128 : index
    %c0_12 = arith.constant 0 : index
    %15 = vector.load %arg1[%c1_10, %c128_11, %c0_12] : memref<3x136x128xbf16, #tpu.memory_space<vmem>>, vector<1x1x128xbf16>
    %16 = vector.shape_cast %15 : vector<1x1x128xbf16> to vector<1x128xbf16>
    %17 = arith.extf %16 : vector<1x128xbf16> to vector<1x128xf32>
    %18 = vector.broadcast %17 : vector<1x128xf32> to vector<8x128xf32>
    %19 = arith.addf %14, %18 : vector<8x128xf32>
    %cst_13 = arith.constant 0.000000e+00 : f32
    %20 = vector.broadcast %cst_13 : f32 to vector<8x128xf32>
    %21 = arith.maximumf %19, %20 : vector<8x128xf32>
    %22 = arith.truncf %21 : vector<8x128xf32> to vector<8x128xbf16>
    %c2 = arith.constant 2 : index
    %c0_14 = arith.constant 0 : index
    %c0_15 = arith.constant 0 : index
    %23 = vector.load %arg1[%c2, %c0_14, %c0_15] : memref<3x136x128xbf16, #tpu.memory_space<vmem>>, vector<1x128x128xbf16>
    %24 = vector.shape_cast %23 : vector<1x128x128xbf16> to vector<128x128xbf16>
    %cst_16 = arith.constant dense<0.000000e+00> : vector<8x128xf32>
    %25 = tpu.matmul %22, %24, %cst_16 {dimension_numbers = #tpu.dot_dimension_numbers<[1], [0], [0], [1], [0, 0, 1, 1], [], []>} : vector<8x128xbf16>, vector<128x128xbf16>, vector<8x128xf32> -> vector<8x128xf32>
    %c2_17 = arith.constant 2 : index
    %c128_18 = arith.constant 128 : index
    %c0_19 = arith.constant 0 : index
    %26 = vector.load %arg1[%c2_17, %c128_18, %c0_19] : memref<3x136x128xbf16, #tpu.memory_space<vmem>>, vector<1x1x128xbf16>
    %27 = vector.shape_cast %26 : vector<1x1x128xbf16> to vector<1x128xbf16>
    %28 = arith.extf %27 : vector<1x128xbf16> to vector<1x128xf32>
    %29 = vector.broadcast %28 : vector<1x128xf32> to vector<8x128xf32>
    %30 = arith.addf %25, %29 : vector<8x128xf32>
    %31 = tpu.iota {dimensions = array<i32: 1>} : vector<8x128xi32>
    %c4_i32 = arith.constant 4 : i32
    %32 = vector.broadcast %c4_i32 : i32 to vector<8x128xi32>
    %33 = arith.cmpi sge, %31, %32 : vector<8x128xi32>
    %cst_20 = arith.constant 0.000000e+00 : f32
    %34 = vector.broadcast %cst_20 : f32 to vector<8x128xf32>
    %35 = arith.maximumf %30, %34 : vector<8x128xf32>
    %cst_21 = arith.constant 9.99999997E-7 : f32
    %36 = vector.broadcast %cst_21 : f32 to vector<8x128xf32>
    %37 = arith.addf %35, %36 : vector<8x128xf32>
    %38 = arith.select %33, %37, %30 : vector<8x128xi1>, vector<8x128xf32>
    %c0_22 = arith.constant 0 : index
    %c0_23 = arith.constant 0 : index
    %39 = vector.load %arg2[%c0_22, %c0_23] : memref<8x128xf32, #tpu.memory_space<vmem>>, vector<8x128xf32>
    tpu.vector_store %arg2[%c0_22, %c0_23], %38 {strides = array<i32>} : memref<8x128xf32, #tpu.memory_space<vmem>>, vector<8x128xf32>,
    return
  }
}

</mosaic_0001>

<bundles_post_ra>
// kernel: stochastic_actor_forward.1
= control target key start
LH: loop header
LB: loop body
LE: loop exit
PB: predicated region body
PF: predicated region fallthrough
CT: control target
= control target key end

     0   :  { %7 = vsyncpa [#allocation3], 0  ;;  %s453_s9 = smov [#allocation2]   ;;  %s511_s0 = inlined_call_operand.vmem [shape: bf16[8,16], index: 0, kind: input, shape index: {}]   ;;  %s512_s1 = inlined_call_operand.hbm [shape: bf16[3,136,128], index: 1, kind: input, shape index: {}]   ;;  %s513_s2 = inlined_call_operand.vmem [shape: f32[8,128], index: 2, kind: output, shape index: {}]  }
   0x1   :  { %s15_s10 = sshll.u32 %s453_s9, 4  ;;  %s429_s13 = scalar_lea.hbm %s512_s1, 3264  ;;  %s16_s10 = int_to_ptr.vmem [resolvable:$true] %s15_s10 }
   0x2   :  { %p430_p0 = scmp.ne.s32.totalorder %s512_s1, %s429_s13  ;;  %p433_p1 = scmp.lt.u32.totalorder %s429_s13, %s512_s1 }
   0x4   :  { %p435_p2 = pnand %p433_p1, %p430_p0 }
   0x6   :  { %438 = shalt.err (!%p435_p2)
}
   0x7   :  { %s439_s18 = scalar_lea.vmem %s16_s10, 3264  ;;  %p444_p4 = scmp.lt.s32.totalorder %s16_s10, %s16_s10 }
   0x8   :  { %p440_p3 = scmp.ne.s32.totalorder %s16_s10, %s439_s18  ;;  %p445_p5 = scmp.lt.s32.totalorder %s439_s18, %s439_s18 }
   0xa   :  { %p446_p6 = por %p445_p5, %p444_p4 }
   0xc   :  { %p447_p7 = pnand %p446_p6, %p440_p3 }
   0xe   :  { %450 = shalt.err (!%p447_p7)
}
   0xf   :  { %s454_s19 = smov 64   ;;  %s455_s20 = smov 4  }
  0x10   :  { %21 = dma.hbm_to_vmem [thread:$0]  %s512_s1, 3264, %s16_s10, [#allocation3], %s454_s19, %s454_s19, %s455_s20  }
  0x11   :  { %451 = dma.done.wait [#allocation3], 3264  }
  0x12   :  { %452 = vsyncadd [#allocation3], 4294964032  ;;  %v456_v0 = vmov 0.0   ;;  %vm457_vm0 = vmmov 0   ;;  %v412_v1 = vld [vmem:[#allocation2] sm:$0xff]   ;;  %vm41_vm1 = vcmask 130048   ;;  %v31_v17 = vlaneseq }
  0x13   :  { %361 = vmatprep.subr.bf16.mxu0 %v456_v0  ;;  %363 = vmatprep.mubr.msk.bf16.mxu0 %vm457_vm0, %v456_v0  ;;  %v26_v2 = vld [vmem:[%s511_s0] sm:$0xf]  ;;  %v413_v3 = vld [vmem:[#allocation2 + $0x44] sm:$0xff]   ;;  %v414_v4 = vld [vmem:[#allocation2 + $0x4c] sm:$0xff]  }
  0x14   :  { %367 = vmatprep.subr.bf16.mxu1 %v456_v0  ;;  %383 = vmatprep.mubr.msk.bf16.mxu1 %vm457_vm0, %v456_v0  ;;  %v415_v5 = vld [vmem:[#allocation2 + $0x54] sm:$0xff]   ;;  %v416_v6 = vld [vmem:[#allocation2 + $0x5c] sm:$0xff]   ;;  %v417_v7 = vld [vmem:[#allocation2 + $0x64] sm:$0xff]   ;;  %v32_v18 = vshrl.u32 %v31_v17, 7  ;;  %v312_v46 = vand.u32 127, %v31_v17 }
  0x15   :  { %362 = vmatpush3.bf16.msra.mxu0 %v412_v1  ;;  %368 = vmatpush3.bf16.msra.mxu1 %v413_v3  ;;  %v418_v8 = vld [vmem:[#allocation2 + $0x6c] sm:$0xff]   ;;  %v419_v9 = vld [vmem:[#allocation2 + $0x74] sm:$0xff]   ;;  %v420_v10 = vld [vmem:[#allocation2 + $0x7c] sm:$0xff]  }
  0x16   :  { %387 = vmatprep.subr.bf16.mxu0 %v456_v0  ;;  %369 = vmatprep.subr.bf16.mxu1 %v456_v0  ;;  %v421_v11 = vld [vmem:[#allocation2 + $0x88] sm:$0xff]   ;;  %v422_v12 = vld [vmem:[#allocation2 + $0x90] sm:$0xff]   ;;  %v423_v13 = vld [vmem:[#allocation2 + $0x98] sm:$0xff]   ;;  %v33_v21 = vsub.s32 0, %v32_v18  ;;  %vm313_vm2 = vcmp.ge.s32.totalorder %v312_v46, 4 }
  0x17   :  { %v424_v14 = vld [vmem:[#allocation2 + $0xa0] sm:$0xff]   ;;  %v425_v15 = vld [vmem:[#allocation2 + $0xa8] sm:$0xff]   ;;  %v426_v16 = vld [vmem:[#allocation2 + $0xb0] sm:$0xff]  }
  0x18   :  { %364 = vmatmul.mubr.msk.bf16.vlgmr.msra.gmra.mrb[0].mxu0 %vm41_vm1, %v26_v2  ;;  %v29_v19 = vld [vmem:[#allocation2 + $0x40] sm:$0x1]  ;;  %v427_v30 = vld [vmem:[#allocation2 + $0xb8] sm:$0xff]   ;;  %v104_v32 = vld [vmem:[#allocation2 + $0x84] sm:$0x1] }
  0x19   :  { %403 = vmatprep.mubr.msk.bf16.mxu0 %vm457_vm0, %v456_v0  ;;  %370 = vmatpush3.bf16.msra.mxu1 %v414_v4  ;;  %v30_v20 = vunpack.c.l.bf16 %v29_v19  ;;  %v428_v31 = vld [vmem:[#allocation2 + $0xc0] sm:$0xff]   ;;  %v105_v33 = vunpack.c.l.bf16 %v104_v32  ;;  %v217_v42 = vld [vmem:[#allocation2 + $0xc8] sm:$0x1] }
  0x1a   :  { %371 = vmatprep.subr.bf16.mxu1 %v456_v0  ;;  %388 = vmatpush3.bf16.msra.mxu0 %v421_v11  ;;  %v218_v43 = vunpack.c.l.bf16 %v217_v42 }
  0x1b   :  { %389 = vmatprep.subr.bf16.mxu0 %v456_v0  ;;  %v34_v22 = vrot.slane %v30_v20, %v33_v21  ;;  %v109_v34 = vrot.slane %v105_v33, %v33_v21 }
  0x1c   :  { %v222_v44 = vrot.slane %v218_v43, %v33_v21 }
  0x1d   :  { %372 = vmatpush3.bf16.msra.mxu1 %v415_v5 }
  0x1e   :  { %373 = vmatprep.subr.bf16.mxu1 %v456_v0  ;;  %390 = vmatpush3.bf16.msra.mxu0 %v422_v12 }
  0x1f   :  { %391 = vmatprep.subr.bf16.mxu0 %v456_v0 }
  0x21   :  { %374 = vmatpush3.bf16.msra.mxu1 %v416_v6 }
  0x22   :  { %375 = vmatprep.subr.bf16.mxu1 %v456_v0  ;;  %392 = vmatpush3.bf16.msra.mxu0 %v423_v13 }
  0x23   :  { %393 = vmatprep.subr.bf16.mxu0 %v456_v0 }
  0x25   :  { %376 = vmatpush3.bf16.msra.mxu1 %v417_v7 }
  0x26   :  { %377 = vmatprep.subr.bf16.mxu1 %v456_v0  ;;  %394 = vmatpush3.bf16.msra.mxu0 %v424_v14 }
  0x27   :  { %395 = vmatprep.subr.bf16.mxu0 %v456_v0 }
  0x29   :  { %378 = vmatpush3.bf16.msra.mxu1 %v418_v8 }
  0x2a   :  { %379 = vmatprep.subr.bf16.mxu1 %v456_v0  ;;  %396 = vmatpush3.bf16.msra.mxu0 %v425_v15 }
  0x2b   :  { %397 = vmatprep.subr.bf16.mxu0 %v456_v0 }
  0x2d   :  { %380 = vmatpush3.bf16.msra.mxu1 %v419_v9 }
  0x2e   :  { %381 = vmatprep.subr.bf16.mxu1 %v456_v0  ;;  %398 = vmatpush3.bf16.msra.mxu0 %v426_v16 }
  0x2f   :  { %399 = vmatprep.subr.bf16.mxu0 %v456_v0 }
  0x31   :  { %382 = vmatpush3.bf16.msra.mxu1 %v420_v10 }
  0x32   :  { %400 = vmatpush3.bf16.msra.mxu0 %v427_v30 }
  0x33   :  { %401 = vmatprep.subr.bf16.mxu0 %v456_v0 }
  0x36   :  { %402 = vmatpush3.bf16.msra.mxu0 %v428_v31 }
  0xeb   :  { %v79_v23 = vpop.f32.mrb[0].mxu0 }
  0xec   :  { %v80_v24 = vadd.f32 %v79_v23, %v34_v22  ;;  %v365_v25 = vpop.f32.mrb[1].mxu0 }
  0xed   :  { %v82_v26 = vpop.f32.mrb[2].mxu0 }
  0xee   :  { %v85_v27 = vmax.f32 %v80_v24, 0.0  ;;  %v366_v28 = vpop.f32.mrb[3].mxu0 }
  0xf0   :  { %v86_v29 = vpack.c.bf16 %v85_v27, %v85_v27 }
  0xf2   :  { %384 = vmatmul.mubr.bf16.vlgmr.msra.gmra.mrb[0].mxu1 %v86_v29 }
 0x1c5   :  { %v192_v35 = vpop.f32.mrb[0].mxu1 }
 0x1c6   :  { %v193_v36 = vadd.f32 %v192_v35, %v109_v34  ;;  %v385_v37 = vpop.f32.mrb[1].mxu1 }
 0x1c7   :  { %v195_v38 = vpop.f32.mrb[2].mxu1 }
 0x1c8   :  { %v198_v39 = vmax.f32 %v193_v36, 0.0  ;;  %v386_v40 = vpop.f32.mrb[3].mxu1 }
 0x1ca   :  { %v199_v41 = vpack.c.bf16 %v198_v39, %v198_v39 }
 0x1cc   :  { %404 = vmatmul.mubr.bf16.vlgmr.msra.gmra.mrb[4].mxu0 %v199_v41 }
 0x29f   :  { %v305_v45 = vpop.f32.mrb[4].mxu0 }
 0x2a0   :  { %v306_v47 = vadd.f32 %v305_v45, %v222_v44  ;;  %v405_v48 = vpop.f32.mrb[5].mxu0 }
 0x2a1   :  { %v308_v49 = vpop.f32.mrb[6].mxu0 }
 0x2a2   :  { %v314_v50 = vmax.f32 %v306_v47, 0.0  ;;  %v406_v51 = vpop.f32.mrb[7].mxu0 }
 0x2a4   :  { %v315_v52 = vadd.f32 1e-06, %v314_v50 }
 0x2a6   :  { %v316_v53 = vsel %vm313_vm2, %v315_v52, %v306_v47 }
 0x2a7   :  { %317 = vst [vmem:[%s513_s2] sm:$0xff] %v316_v53 }
 0x2a8   :  { %322 = vsyncpa [#allocation3], 1 }

</bundles_post_ra>
